<compile_context>
chip_gen: v7x
topology: tpu7x:2x2x1
jax: 0.10.0
libtpu: 0.0.40
codegen_flags: <defaults>
</compile_context>

<pallas_src>
import functools

import jax
import jax.numpy as jnp
from jax.experimental import pallas as pl
from jax.experimental.pallas import tpu as pltpu

LN_EPS = 1e-5


def _round_up(x, m):
    return (x + m - 1) // m * m


def _vmem_capacity_bytes():
    """Physical VMEM per TensorCore; conservative fallback if unavailable."""
    try:
        return int(pltpu.get_tpu_info().vmem_capacity_bytes)
    except Exception:
        return 64 << 20  # assume the smallest (v7x)


def _transition_kernel(s_ref, w1_ref, b1_ref, w2_ref, b2_ref, w3_ref, b3_ref,
                       gamma_ref, beta_ref, out_ref, *, num_layers,
                       matmul_dtype):
    # s tile: (tm, D).  Matmul operands go to the MXU in `matmul_dtype`
    # (bf16 by default -> full-rate MXU) with f32 accumulation; all other
    # math (bias, relu, residual, LayerNorm) stays in f32.
    s0 = s_ref[...].astype(jnp.float32)

    def layer(l, s):
        # `l` may be a static Python int (unrolled path) or a traced int32
        # (fori_loop path); both index the leading (layer) axis of the refs.
        s_initial = s
        h = jnp.dot(s.astype(matmul_dtype), w1_ref[l],
                    preferred_element_type=jnp.float32) + b1_ref[pl.ds(l, 1), :]
        h = jnp.maximum(h, 0.0)
        h = jnp.dot(h.astype(matmul_dtype), w2_ref[l],
                    preferred_element_type=jnp.float32) + b2_ref[pl.ds(l, 1), :]
        h = jnp.maximum(h, 0.0)
        h = jnp.dot(h.astype(matmul_dtype), w3_ref[l],
                    preferred_element_type=jnp.float32) + b3_ref[pl.ds(l, 1), :]
        return h + s_initial

    if num_layers <= 2:
        # Small layer counts: static unroll (best LLO scheduling visibility).
        s = s0
        for l in range(num_layers):
            s = layer(l, s)
    else:
        # Larger layer counts: bound live ranges / code size with fori_loop.
        s = jax.lax.fori_loop(0, num_layers, layer, s0)

    # LayerNorm over the channel (last) dim, f32, biased variance (matches
    # torch.nn.LayerNorm).  Rows in the ragged last block may hold garbage;
    # they are row-local and masked on write-back, so this is safe.
    mean = jnp.mean(s, axis=-1, keepdims=True)
    centered = s - mean
    var = jnp.mean(centered * centered, axis=-1, keepdims=True)
    normed = centered * jax.lax.rsqrt(var + LN_EPS)
    out = normed * gamma_ref[...] + beta_ref[...]

    out_ref[...] = out.astype(out_ref.dtype)


def prepare_params(params, matmul_dtype=jnp.bfloat16):
    """One-time cast of the matmul weights to the MXU dtype (hoisted out of
    the per-call hot path so jitted callers don't re-read the f32 stack)."""
    p = dict(params)
    for k in ("w1", "w2", "w3"):
        p[k] = params[k].astype(matmul_dtype)
    return p


def structure_module_transition(s, params, *, tm=512,
                                matmul_dtype=jnp.bfloat16):
    """s: [..., dim] float32.  params: dict of stacked layer weights.

    Weights w1/w2/w3: [L, dim, dim] (ideally pre-cast via prepare_params),
    biases b1/b2/b3: [L, dim], gamma/beta: [1, dim].
    """
    w1, b1, w2, b2, w3, b3, gamma, beta = (
        params["w1"], params["b1"], params["w2"], params["b2"],
        params["w3"], params["b3"], params["gamma"], params["beta"],
    )
    num_layers, dim, _ = w1.shape
    orig_shape = s.shape

    # Fallback cast (prefer prepare_params() once at setup; under jit this
    # per-call cast re-reads the full f32 weight stack from HBM).
    if w1.dtype != jnp.dtype(matmul_dtype):
        w1, w2, w3 = (w.astype(matmul_dtype) for w in (w1, w2, w3))

    # NOTE: for production dims (>=128) the channel axis is lane-dense; the
    # tiny demo dim (32) under-fills the 128-lane vregs but stays correct.
    s2d = s.reshape(-1, dim)
    n_rows = s2d.shape[0]

    # Row tiling: big tiles (default 512) for DMA efficiency / fewer grid
    # steps; always a multiple of 8 (f32 sublane).  No host padding: the grid
    # is cdiv(n_rows, tm) and Pallas masks the ragged last block.
    n_ceil = _round_up(n_rows, 8)
    tm_eff = max(8, _round_up(min(tm, n_ceil), 8))
    if n_rows >= 256:
        # Keep >= ~4 grid steps when rows are plentiful so the "parallel" row
        # axis can be split across both v7x TensorCores.
        tm_eff = min(tm_eff, max(64, _round_up(pl.cdiv(n_rows, 4), 8)))
    grid = (pl.cdiv(n_rows, tm_eff),)

    # --- VMEM budget ------------------------------------------------------
    w_bytes = 3 * num_layers * dim * dim * jnp.dtype(w1.dtype).itemsize
    b_bytes = (3 * num_layers + 2) * dim * 4
    # Constant-index operands are DMA'd once but the pipeline still holds two
    # buffers for them; in/out row tiles are double-buffered; ~4 f32
    # intermediates (s, s_initial, h, cast temp) live inside the layer body.
    resident = 2 * (w_bytes + b_bytes) + (2 * 2 + 4) * tm_eff * dim * 4
    needed = resident + (2 << 20)                      # margin for compiler scratch
    vmem_cap = int(0.75 * _vmem_capacity_bytes())      # ~48 MiB v7x, ~96 MiB v5e/v6e
    vmem_limit = int(min(max(needed, 16 << 20), vmem_cap))

    cost = pl.CostEstimate(
        flops=2 * n_rows * dim * dim * 3 * num_layers,
        transcendentals=n_rows,                        # rsqrt per row
        bytes_accessed=int(2 * n_rows * dim * 4 + w_bytes + b_bytes),
    )

    kernel = functools.partial(_transition_kernel, num_layers=num_layers,
                               matmul_dtype=matmul_dtype)

    const3 = lambda i: (0, 0, 0)
    const2 = lambda i: (0, 0)
    w_spec = pl.BlockSpec((num_layers, dim, dim), const3)
    b_spec = pl.BlockSpec((num_layers, dim), const2)
    g_spec = pl.BlockSpec((1, dim), const2)

    out = pl.pallas_call(
        kernel,
        out_shape=jax.ShapeDtypeStruct((n_rows, dim), s.dtype),
        grid_spec=pltpu.PrefetchScalarGridSpec(
            num_scalar_prefetch=0,
            grid=grid,
            in_specs=[
                pl.BlockSpec((tm_eff, dim), lambda i: (i, 0)),   # s tile
                w_spec, b_spec,                                  # w1, b1
                w_spec, b_spec,                                  # w2, b2
                w_spec, b_spec,                                  # w3, b3
                g_spec, g_spec,                                  # gamma, beta
            ],
            out_specs=pl.BlockSpec((tm_eff, dim), lambda i: (i, 0)),
        ),
        compiler_params=pltpu.CompilerParams(
            dimension_semantics=("parallel",),
            vmem_limit_bytes=vmem_limit,
        ),
        cost_estimate=cost,
    )(s2d, w1, b1, w2, b2, w3, b3, gamma, beta)

    return out.reshape(orig_shape)


def init_params(key, dim, num_layers):
    """Deterministic synthetic parameters (shapes match the PyTorch module)."""
    keys = jax.random.split(key, 6 * num_layers)
    scale = 1.0 / jnp.sqrt(dim)

    def lin(k):
        return jax.random.normal(k, (dim, dim), jnp.float32) * scale

    def bias(k):
        return jax.random.normal(k, (dim,), jnp.float32) * 0.01

    w1 = jnp.stack([lin(keys[6 * l + 0]) for l in range(num_layers)])
    b1 = jnp.stack([bias(keys[6 * l + 1]) for l in range(num_layers)])
    w2 = jnp.stack([lin(keys[6 * l + 2]) for l in range(num_layers)])
    b2 = jnp.stack([bias(keys[6 * l + 3]) for l in range(num_layers)])
    w3 = jnp.stack([lin(keys[6 * l + 4]) for l in range(num_layers)])
    b3 = jnp.stack([bias(keys[6 * l + 5]) for l in range(num_layers)])
    gamma = jnp.ones((1, dim), jnp.float32)
    beta = jnp.zeros((1, dim), jnp.float32)
    return dict(w1=w1, b1=b1, w2=w2, b2=b2, w3=w3, b3=b3,
                gamma=gamma, beta=beta)


def reference(s, params):
    """Pure-JAX f32 reference of the PyTorch forward pass."""
    w1, b1, w2, b2, w3, b3 = (params["w1"], params["b1"], params["w2"],
                              params["b2"], params["w3"], params["b3"])
    num_layers = w1.shape[0]
    for l in range(num_layers):
        s0 = s
        h = jax.nn.relu(s @ w1[l] + b1[l])
        h = jax.nn.relu(h @ w2[l] + b2[l])
        h = h @ w3[l] + b3[l]
        s = h + s0
    mean = jnp.mean(s, axis=-1, keepdims=True)
    var = jnp.mean((s - mean) ** 2, axis=-1, keepdims=True)
    s = (s - mean) / jnp.sqrt(var + LN_EPS)
    return s * params["gamma"] + params["beta"]


if __name__ == "__main__":
    key = jax.random.PRNGKey(0)
    k_s, k_p, k_s2, k_p3 = jax.random.split(key, 4)

    batch, seq, dim = 2, 8, 32
    num_layers = 2

    s = jax.random.normal(k_s, (batch, seq, dim), jnp.float32)
    params = init_params(k_p, dim, num_layers)
    ref = reference(s.reshape(-1, dim), params).reshape(s.shape)

    # Default path: weights pre-cast once to bf16 (MXU operands), f32
    # accumulation / LayerNorm.
    params_bf16 = prepare_params(params, jnp.bfloat16)
    out_bf16 = jax.block_until_ready(
        structure_module_transition(s, params_bf16))
    assert out_bf16.shape == s.shape and out_bf16.dtype == s.dtype
    assert jnp.allclose(out_bf16, ref, atol=5e-2, rtol=5e-2), \
        "bf16-matmul kernel mismatch vs f32 reference"

    # f32-matmul path: exact check against the reference.
    out_f32 = jax.block_until_ready(
        structure_module_transition(s, params, matmul_dtype=jnp.float32))
    assert jnp.allclose(out_f32, ref, atol=1e-4, rtol=1e-4), \
        "f32 kernel mismatch vs reference"

    # Ragged row count (not divisible by the row tile): maskless ragged grid,
    # no host pad / slice.
    s_ragged = jax.random.normal(k_s2, (3, 33, dim), jnp.float32)
    ref_ragged = reference(s_ragged.reshape(-1, dim), params).reshape(
        s_ragged.shape)
    out_ragged = jax.block_until_ready(
        structure_module_transition(s_ragged, params, tm=32,
                                    matmul_dtype=jnp.float32))
    assert jnp.allclose(out_ragged, ref_ragged, atol=1e-4, rtol=1e-4), \
        "ragged-row kernel mismatch vs reference"

    # num_layers > 2 exercises the in-kernel fori_loop (dynamic layer index).
    params3 = init_params(k_p3, dim, 3)
    ref3 = reference(s.reshape(-1, dim), params3).reshape(s.shape)
    out3 = jax.block_until_ready(
        structure_module_transition(s, params3, matmul_dtype=jnp.float32))
    assert jnp.allclose(out3, ref3, atol=1e-4, rtol=1e-4), \
        "fori_loop (num_layers=3) kernel mismatch vs reference"

    print("KERNEL_OK")
</pallas_src>

<mosaic_0001>
module attributes {stable_mosaic.version = 11 : i64} {
  func.func @_transition_kernel(%arg0: i32, %arg1: memref<16x32xf32, #tpu.memory_space<vmem>>, %arg2: memref<2x32x32xbf16, #tpu.memory_space<vmem>>, %arg3: memref<2x32xf32, #tpu.memory_space<vmem>>, %arg4: memref<2x32x32xbf16, #tpu.memory_space<vmem>>, %arg5: memref<2x32xf32, #tpu.memory_space<vmem>>, %arg6: memref<2x32x32xbf16, #tpu.memory_space<vmem>>, %arg7: memref<2x32xf32, #tpu.memory_space<vmem>>, %arg8: memref<1x32xf32, #tpu.memory_space<vmem>>, %arg9: memref<1x32xf32, #tpu.memory_space<vmem>>, %arg10: memref<16x32xf32, #tpu.memory_space<vmem>>) attributes {dimension_semantics = [#tpu.dimension_semantics<parallel>], iteration_bounds = array<i64: 1>, scalar_prefetch = 0 : i64, scratch_operands = 0 : i64, tpu.core_type = #tpu.core_type<tc>, window_params = [{transform_indices = @transform_0, window_bounds = array<i64: 16, 32>}, {pipeline_mode = #tpu.pipeline_mode<synchronous>, transform_indices = @transform_1, window_bounds = array<i64: 2, 32, 32>}, {pipeline_mode = #tpu.pipeline_mode<synchronous>, transform_indices = @transform_2, window_bounds = array<i64: 2, 32>}, {pipeline_mode = #tpu.pipeline_mode<synchronous>, transform_indices = @transform_3, window_bounds = array<i64: 2, 32, 32>}, {pipeline_mode = #tpu.pipeline_mode<synchronous>, transform_indices = @transform_4, window_bounds = array<i64: 2, 32>}, {pipeline_mode = #tpu.pipeline_mode<synchronous>, transform_indices = @transform_5, window_bounds = array<i64: 2, 32, 32>}, {pipeline_mode = #tpu.pipeline_mode<synchronous>, transform_indices = @transform_6, window_bounds = array<i64: 2, 32>}, {pipeline_mode = #tpu.pipeline_mode<synchronous>, transform_indices = @transform_7, window_bounds = array<i64: 1, 32>}, {pipeline_mode = #tpu.pipeline_mode<synchronous>, transform_indices = @transform_8, window_bounds = array<i64: 1, 32>}, {transform_indices = @transform_9, window_bounds = array<i64: 16, 32>}]} {
    %c0 = arith.constant 0 : index
    %c0_0 = arith.constant 0 : index
    %0 = vector.load %arg1[%c0, %c0_0] : memref<16x32xf32, #tpu.memory_space<vmem>>, vector<16x32xf32>
    %1 = arith.truncf %0 : vector<16x32xf32> to vector<16x32xbf16>
    %c0_1 = arith.constant 0 : index
    %c0_2 = arith.constant 0 : index
    %c0_3 = arith.constant 0 : index
    %2 = vector.load %arg2[%c0_1, %c0_2, %c0_3] : memref<2x32x32xbf16, #tpu.memory_space<vmem>>, vector<1x32x32xbf16>
    %3 = vector.shape_cast %2 : vector<1x32x32xbf16> to vector<32x32xbf16>
    %cst = arith.constant dense<0.000000e+00> : vector<16x32xf32>
    %4 = tpu.matmul %1, %3, %cst {dimension_numbers = #tpu.dot_dimension_numbers<[1], [0], [0], [1], [0, 0, 1, 1], [], []>} : vector<16x32xbf16>, vector<32x32xbf16>, vector<16x32xf32> -> vector<16x32xf32>
    %c0_4 = arith.constant 0 : index
    %c0_5 = arith.constant 0 : index
    %5 = vector.load %arg3[%c0_4, %c0_5] : memref<2x32xf32, #tpu.memory_space<vmem>>, vector<1x32xf32>
    %6 = vector.broadcast %5 : vector<1x32xf32> to vector<16x32xf32>
    %7 = arith.addf %4, %6 : vector<16x32xf32>
    %cst_6 = arith.constant 0.000000e+00 : f32
    %8 = vector.broadcast %cst_6 : f32 to vector<16x32xf32>
    %9 = arith.maximumf %7, %8 : vector<16x32xf32>
    %10 = arith.truncf %9 : vector<16x32xf32> to vector<16x32xbf16>
    %c0_7 = arith.constant 0 : index
    %c0_8 = arith.constant 0 : index
    %c0_9 = arith.constant 0 : index
    %11 = vector.load %arg4[%c0_7, %c0_8, %c0_9] : memref<2x32x32xbf16, #tpu.memory_space<vmem>>, vector<1x32x32xbf16>
    %12 = vector.shape_cast %11 : vector<1x32x32xbf16> to vector<32x32xbf16>
    %cst_10 = arith.constant dense<0.000000e+00> : vector<16x32xf32>
    %13 = tpu.matmul %10, %12, %cst_10 {dimension_numbers = #tpu.dot_dimension_numbers<[1], [0], [0], [1], [0, 0, 1, 1], [], []>} : vector<16x32xbf16>, vector<32x32xbf16>, vector<16x32xf32> -> vector<16x32xf32>
    %c0_11 = arith.constant 0 : index
    %c0_12 = arith.constant 0 : index
    %14 = vector.load %arg5[%c0_11, %c0_12] : memref<2x32xf32, #tpu.memory_space<vmem>>, vector<1x32xf32>
    %15 = vector.broadcast %14 : vector<1x32xf32> to vector<16x32xf32>
    %16 = arith.addf %13, %15 : vector<16x32xf32>
    %cst_13 = arith.constant 0.000000e+00 : f32
    %17 = vector.broadcast %cst_13 : f32 to vector<16x32xf32>
    %18 = arith.maximumf %16, %17 : vector<16x32xf32>
    %19 = arith.truncf %18 : vector<16x32xf32> to vector<16x32xbf16>
    %c0_14 = arith.constant 0 : index
    %c0_15 = arith.constant 0 : index
    %c0_16 = arith.constant 0 : index
    %20 = vector.load %arg6[%c0_14, %c0_15, %c0_16] : memref<2x32x32xbf16, #tpu.memory_space<vmem>>, vector<1x32x32xbf16>
    %21 = vector.shape_cast %20 : vector<1x32x32xbf16> to vector<32x32xbf16>
    %cst_17 = arith.constant dense<0.000000e+00> : vector<16x32xf32>
    %22 = tpu.matmul %19, %21, %cst_17 {dimension_numbers = #tpu.dot_dimension_numbers<[1], [0], [0], [1], [0, 0, 1, 1], [], []>} : vector<16x32xbf16>, vector<32x32xbf16>, vector<16x32xf32> -> vector<16x32xf32>
    %c0_18 = arith.constant 0 : index
    %c0_19 = arith.constant 0 : index
    %23 = vector.load %arg7[%c0_18, %c0_19] : memref<2x32xf32, #tpu.memory_space<vmem>>, vector<1x32xf32>
    %24 = vector.broadcast %23 : vector<1x32xf32> to vector<16x32xf32>
    %25 = arith.addf %22, %24 : vector<16x32xf32>
    %26 = arith.addf %25, %0 : vector<16x32xf32>
    %27 = arith.truncf %26 : vector<16x32xf32> to vector<16x32xbf16>
    %c1 = arith.constant 1 : index
    %c0_20 = arith.constant 0 : index
    %c0_21 = arith.constant 0 : index
    %28 = vector.load %arg2[%c1, %c0_20, %c0_21] : memref<2x32x32xbf16, #tpu.memory_space<vmem>>, vector<1x32x32xbf16>
    %29 = vector.shape_cast %28 : vector<1x32x32xbf16> to vector<32x32xbf16>
    %cst_22 = arith.constant dense<0.000000e+00> : vector<16x32xf32>
    %30 = tpu.matmul %27, %29, %cst_22 {dimension_numbers = #tpu.dot_dimension_numbers<[1], [0], [0], [1], [0, 0, 1, 1], [], []>} : vector<16x32xbf16>, vector<32x32xbf16>, vector<16x32xf32> -> vector<16x32xf32>
    %c1_23 = arith.constant 1 : index
    %c0_24 = arith.constant 0 : index
    %31 = vector.load %arg3[%c1_23, %c0_24] : memref<2x32xf32, #tpu.memory_space<vmem>>, vector<1x32xf32>
    %32 = vector.broadcast %31 : vector<1x32xf32> to vector<16x32xf32>
    %33 = arith.addf %30, %32 : vector<16x32xf32>
    %cst_25 = arith.constant 0.000000e+00 : f32
    %34 = vector.broadcast %cst_25 : f32 to vector<16x32xf32>
    %35 = arith.maximumf %33, %34 : vector<16x32xf32>
    %36 = arith.truncf %35 : vector<16x32xf32> to vector<16x32xbf16>
    %c1_26 = arith.constant 1 : index
    %c0_27 = arith.constant 0 : index
    %c0_28 = arith.constant 0 : index
    %37 = vector.load %arg4[%c1_26, %c0_27, %c0_28] : memref<2x32x32xbf16, #tpu.memory_space<vmem>>, vector<1x32x32xbf16>
    %38 = vector.shape_cast %37 : vector<1x32x32xbf16> to vector<32x32xbf16>
    %cst_29 = arith.constant dense<0.000000e+00> : vector<16x32xf32>
    %39 = tpu.matmul %36, %38, %cst_29 {dimension_numbers = #tpu.dot_dimension_numbers<[1], [0], [0], [1], [0, 0, 1, 1], [], []>} : vector<16x32xbf16>, vector<32x32xbf16>, vector<16x32xf32> -> vector<16x32xf32>
    %c1_30 = arith.constant 1 : index
    %c0_31 = arith.constant 0 : index
    %40 = vector.load %arg5[%c1_30, %c0_31] : memref<2x32xf32, #tpu.memory_space<vmem>>, vector<1x32xf32>
    %41 = vector.broadcast %40 : vector<1x32xf32> to vector<16x32xf32>
    %42 = arith.addf %39, %41 : vector<16x32xf32>
    %cst_32 = arith.constant 0.000000e+00 : f32
    %43 = vector.broadcast %cst_32 : f32 to vector<16x32xf32>
    %44 = arith.maximumf %42, %43 : vector<16x32xf32>
    %45 = arith.truncf %44 : vector<16x32xf32> to vector<16x32xbf16>
    %c1_33 = arith.constant 1 : index
    %c0_34 = arith.constant 0 : index
    %c0_35 = arith.constant 0 : index
    %46 = vector.load %arg6[%c1_33, %c0_34, %c0_35] : memref<2x32x32xbf16, #tpu.memory_space<vmem>>, vector<1x32x32xbf16>
    %47 = vector.shape_cast %46 : vector<1x32x32xbf16> to vector<32x32xbf16>
    %cst_36 = arith.constant dense<0.000000e+00> : vector<16x32xf32>
    %48 = tpu.matmul %45, %47, %cst_36 {dimension_numbers = #tpu.dot_dimension_numbers<[1], [0], [0], [1], [0, 0, 1, 1], [], []>} : vector<16x32xbf16>, vector<32x32xbf16>, vector<16x32xf32> -> vector<16x32xf32>
    %c1_37 = arith.constant 1 : index
    %c0_38 = arith.constant 0 : index
    %49 = vector.load %arg7[%c1_37, %c0_38] : memref<2x32xf32, #tpu.memory_space<vmem>>, vector<1x32xf32>
    %50 = vector.broadcast %49 : vector<1x32xf32> to vector<16x32xf32>
    %51 = arith.addf %48, %50 : vector<16x32xf32>
    %52 = arith.addf %51, %26 : vector<16x32xf32>
    %cst_39 = arith.constant dense<0.000000e+00> : vector<16xf32>
    %53 = vector.multi_reduction <add>, %52, %cst_39 [1] : vector<16x32xf32> to vector<16xf32>
    %54 = vector.shape_cast %53 : vector<16xf32> to vector<16x1xf32>
    %cst_40 = arith.constant 3.200000e+01 : f32
    %55 = vector.broadcast %cst_40 : f32 to vector<16x1xf32>
    %56 = arith.divf %54, %55 : vector<16x1xf32>
    %57 = vector.broadcast %56 : vector<16x1xf32> to vector<16x32xf32>
    %58 = arith.subf %52, %57 : vector<16x32xf32>
    %59 = arith.mulf %58, %58 : vector<16x32xf32>
    %cst_41 = arith.constant dense<0.000000e+00> : vector<16xf32>
    %60 = vector.multi_reduction <add>, %59, %cst_41 [1] : vector<16x32xf32> to vector<16xf32>
    %61 = vector.shape_cast %60 : vector<16xf32> to vector<16x1xf32>
    %cst_42 = arith.constant 3.200000e+01 : f32
    %62 = vector.broadcast %cst_42 : f32 to vector<16x1xf32>
    %63 = arith.divf %61, %62 : vector<16x1xf32>
    %cst_43 = arith.constant 9.99999974E-6 : f32
    %64 = vector.broadcast %cst_43 : f32 to vector<16x1xf32>
    %65 = arith.addf %63, %64 : vector<16x1xf32>
    %66 = math.rsqrt %65 : vector<16x1xf32>
    %67 = vector.broadcast %66 : vector<16x1xf32> to vector<16x32xf32>
    %68 = arith.mulf %58, %67 : vector<16x32xf32>
    %c0_44 = arith.constant 0 : index
    %c0_45 = arith.constant 0 : index
    %69 = vector.load %arg8[%c0_44, %c0_45] : memref<1x32xf32, #tpu.memory_space<vmem>>, vector<1x32xf32>
    %70 = vector.broadcast %69 : vector<1x32xf32> to vector<16x32xf32>
    %71 = arith.mulf %68, %70 : vector<16x32xf32>
    %c0_46 = arith.constant 0 : index
    %c0_47 = arith.constant 0 : index
    %72 = vector.load %arg9[%c0_46, %c0_47] : memref<1x32xf32, #tpu.memory_space<vmem>>, vector<1x32xf32>
    %73 = vector.broadcast %72 : vector<1x32xf32> to vector<16x32xf32>
    %74 = arith.addf %71, %73 : vector<16x32xf32>
    %c0_48 = arith.constant 0 : index
    %c0_49 = arith.constant 0 : index
    %75 = vector.load %arg10[%c0_48, %c0_49] : memref<16x32xf32, #tpu.memory_space<vmem>>, vector<16x32xf32>
    tpu.vector_store %arg10[%c0_48, %c0_49], %74 {strides = array<i32>} : memref<16x32xf32, #tpu.memory_space<vmem>>, vector<16x32xf32>,
    return
  }
  func.func @transform_0(%arg0: i32) -> (i32, i32) {
    %c0_i32 = arith.constant 0 : i32
    %c0_i32_0 = arith.constant 0 : i32
    return %arg0, %c0_i32 : i32, i32
  }
  func.func @transform_1(%arg0: i32) -> (i32, i32, i32) {
    %c0_i32 = arith.constant 0 : i32
    %c0_i32_0 = arith.constant 0 : i32
    %c0_i32_1 = arith.constant 0 : i32
    %c0_i32_2 = arith.constant 0 : i32
    return %c0_i32, %c0_i32_0, %c0_i32_1 : i32, i32, i32
  }
  func.func @transform_2(%arg0: i32) -> (i32, i32) {
    %c0_i32 = arith.constant 0 : i32
    %c0_i32_0 = arith.constant 0 : i32
    %c0_i32_1 = arith.constant 0 : i32
    return %c0_i32, %c0_i32_0 : i32, i32
  }
  func.func @transform_3(%arg0: i32) -> (i32, i32, i32) {
    %c0_i32 = arith.constant 0 : i32
    %c0_i32_0 = arith.constant 0 : i32
    %c0_i32_1 = arith.constant 0 : i32
    %c0_i32_2 = arith.constant 0 : i32
    return %c0_i32, %c0_i32_0, %c0_i32_1 : i32, i32, i32
  }
  func.func @transform_4(%arg0: i32) -> (i32, i32) {
    %c0_i32 = arith.constant 0 : i32
    %c0_i32_0 = arith.constant 0 : i32
    %c0_i32_1 = arith.constant 0 : i32
    return %c0_i32, %c0_i32_0 : i32, i32
  }
  func.func @transform_5(%arg0: i32) -> (i32, i32, i32) {
    %c0_i32 = arith.constant 0 : i32
    %c0_i32_0 = arith.constant 0 : i32
    %c0_i32_1 = arith.constant 0 : i32
    %c0_i32_2 = arith.constant 0 : i32
    return %c0_i32, %c0_i32_0, %c0_i32_1 : i32, i32, i32
  }
  func.func @transform_6(%arg0: i32) -> (i32, i32) {
    %c0_i32 = arith.constant 0 : i32
    %c0_i32_0 = arith.constant 0 : i32
    %c0_i32_1 = arith.constant 0 : i32
    return %c0_i32, %c0_i32_0 : i32, i32
  }
  func.func @transform_7(%arg0: i32) -> (i32, i32) {
    %c0_i32 = arith.constant 0 : i32
    %c0_i32_0 = arith.constant 0 : i32
    %c0_i32_1 = arith.constant 0 : i32
    return %c0_i32, %c0_i32_0 : i32, i32
  }
  func.func @transform_8(%arg0: i32) -> (i32, i32) {
    %c0_i32 = arith.constant 0 : i32
    %c0_i32_0 = arith.constant 0 : i32
    %c0_i32_1 = arith.constant 0 : i32
    return %c0_i32, %c0_i32_0 : i32, i32
  }
  func.func @transform_9(%arg0: i32) -> (i32, i32) {
    %c0_i32 = arith.constant 0 : i32
    %c0_i32_0 = arith.constant 0 : i32
    return %arg0, %c0_i32 : i32, i32
  }
}

</mosaic_0001>

<bundles_post_ra>
// kernel: tpu_custom_call.1
= control target key start
LH: loop header
LB: loop body
LE: loop exit
PB: predicated region body
PF: predicated region fallthrough
CT: control target
= control target key end

     0   :  { %14 = vsyncpa [#allocation3], 0  ;;  %s1009_s0 = inlined_call_operand.hbm [shape: f32[16,32], index: 0, kind: input, shape index: {}]   ;;  %s1010_s1 = inlined_call_operand.hbm [shape: bf16[2,32,32], index: 1, kind: input, shape index: {}]   ;;  %s1011_s2 = inlined_call_operand.vmem [shape: f32[2,32], index: 2, kind: input, shape index: {}]   ;;  %s1012_s3 = inlined_call_operand.hbm [shape: bf16[2,32,32], index: 3, kind: input, shape index: {}]   ;;  %s1013_s4 = inlined_call_operand.vmem [shape: f32[2,32], index: 4, kind: input, shape index: {}]   ;;  %s1014_s5 = inlined_call_operand.hbm [shape: bf16[2,32,32], index: 5, kind: input, shape index: {}]   ;;  %s1015_s6 = inlined_call_operand.vmem [shape: f32[2,32], index: 6, kind: input, shape index: {}]   ;;  %s1016_s7 = inlined_call_operand.vmem [shape: f32[1,32], index: 7, kind: input, shape index: {}]   ;;  %s1017_s8 = inlined_call_operand.vmem [shape: f32[1,32], index: 8, kind: input, shape index: {}]   ;;  %s1018_s9 = inlined_call_operand.hbm [shape: f32[16,32], index: 9, kind: output, shape index: {}]  }
   0x1   :  { %15 = vsyncpa [#allocation6], 0 }
   0x2   :  { %16 = vsyncpa [#allocation9], 0 }
   0x3   :  { %17 = vsyncpa [#allocation4], 0  ;;  %s806_s30 = smov [#allocation5]   ;;  %s688_s13 = scalar_lea.hbm %s1010_s1, 512 }
   0x4   :  { %s35_s10 = sshll.u32 %s806_s30, 4  ;;  %p689_p0 = scmp.ne.s32.totalorder %s1010_s1, %s688_s13  ;;  %s36_s10 = int_to_ptr.vmem [resolvable:$true] %s35_s10 }
   0x5   :  { %p692_p1 = scmp.lt.u32.totalorder %s688_s13, %s1010_s1 }
   0x7   :  { %p694_p2 = pnand %p692_p1, %p689_p0 }
   0x9   :  { %697 = shalt.err (!%p694_p2)
}
   0xa   :  { %s698_s18 = scalar_lea.vmem %s36_s10, 512  ;;  %p703_p4 = scmp.lt.s32.totalorder %s36_s10, %s36_s10 }
   0xb   :  { %p699_p3 = scmp.ne.s32.totalorder %s36_s10, %s698_s18  ;;  %p704_p5 = scmp.lt.s32.totalorder %s698_s18, %s698_s18 }
   0xd   :  { %p705_p6 = por %p704_p5, %p703_p4 }
   0xf   :  { %p706_p7 = pnand %p705_p6, %p699_p3 }
  0x11   :  { %709 = shalt.err (!%p706_p7)
}
  0x12   :  { %s807_s19 = smov 64   ;;  %s808_s20 = smov 4  }
  0x13   :  { %41 = dma.hbm_to_vmem [thread:$0]  %s1010_s1, 512, %s36_s10, [#allocation6], %s807_s19, %s807_s19, %s808_s20  }
  0x14   :  { %s809_s23 = smov [#allocation2]   ;;  %s710_s27 = scalar_lea.hbm %s1009_s0, 256 }
  0x15   :  { %s23_s24 = sshll.u32 %s809_s23, 4  ;;  %p711_p8 = scmp.ne.s32.totalorder %s1009_s0, %s710_s27  ;;  %s24_s24 = int_to_ptr.vmem [resolvable:$true] %s23_s24 }
  0x16   :  { %p714_p9 = scmp.lt.u32.totalorder %s710_s27, %s1009_s0 }
  0x18   :  { %p716_p10 = pnand %p714_p9, %p711_p8 }
  0x1a   :  { %719 = shalt.err (!%p716_p10)
}
  0x1b   :  { %s720_s12 = scalar_lea.vmem %s24_s24, 256  ;;  %p725_p12 = scmp.lt.s32.totalorder %s24_s24, %s24_s24 }
  0x1c   :  { %p721_p11 = scmp.ne.s32.totalorder %s24_s24, %s720_s12  ;;  %p726_p13 = scmp.lt.s32.totalorder %s720_s12, %s720_s12 }
  0x1e   :  { %p727_p0 = por %p726_p13, %p725_p12 }
  0x20   :  { %p728_p1 = pnand %p727_p0, %p721_p11 }
  0x22   :  { %731 = shalt.err (!%p728_p1)
}
  0x23   :  { %s810_s1 = smov 128   ;;  %s811_s10 = smov 8  }
  0x24   :  { %29 = dma.hbm_to_vmem [thread:$0]  %s1009_s0, 256, %s24_s24, [#allocation3], %s810_s1, %s810_s1, %s811_s10  }
  0x25   :  { %s812_s15 = smov [#allocation7]   ;;  %s813_s17 = smov [#allocation8]  }
  0x26   :  { %s49_s16 = sshll.u32 %s812_s15, 4  ;;  %s63_s18 = sshll.u32 %s813_s17, 4  ;;  %s50_s16 = int_to_ptr.vmem [resolvable:$true] %s49_s16  ;;  %s897_s18 = int_to_ptr.vmem [resolvable:$true] %s63_s18 }
  0x27   :  { %s732_s23 = scalar_lea.hbm %s1012_s3, 512 }
  0x28   :  { %p733_p2 = scmp.ne.s32.totalorder %s1012_s3, %s732_s23  ;;  %p736_p3 = scmp.lt.u32.totalorder %s732_s23, %s1012_s3 }
  0x2a   :  { %p738_p4 = pnand %p736_p3, %p733_p2 }
  0x2c   :  { %741 = shalt.err (!%p738_p4)
}
  0x2d   :  { %s742_s0 = scalar_lea.vmem %s50_s16, 512  ;;  %p747_p6 = scmp.lt.s32.totalorder %s50_s16, %s50_s16 }
  0x2e   :  { %p743_p5 = scmp.ne.s32.totalorder %s50_s16, %s742_s0  ;;  %p748_p7 = scmp.lt.s32.totalorder %s742_s0, %s742_s0 }
  0x30   :  { %p749_p8 = por %p748_p7, %p747_p6 }
  0x32   :  { %p750_p9 = pnand %p749_p8, %p743_p5 }
  0x34   :  { %753 = shalt.err (!%p750_p9)
}
  0x35   :  { %55 = dma.hbm_to_vmem [thread:$0]  %s1012_s3, 512, %s50_s16, [#allocation6], %s807_s19, %s807_s19, %s808_s20  }
  0x36   :  { %s754_s12 = scalar_lea.hbm %s1014_s5, 512 }
  0x37   :  { %p755_p10 = scmp.ne.s32.totalorder %s1014_s5, %s754_s12  ;;  %p758_p11 = scmp.lt.u32.totalorder %s754_s12, %s1014_s5 }
  0x39   :  { %p760_p12 = pnand %p758_p11, %p755_p10 }
  0x3b   :  { %763 = shalt.err (!%p760_p12)
}
  0x3c   :  { %s764_s21 = scalar_lea.vmem %s897_s18, 512  ;;  %p769_p0 = scmp.lt.s32.totalorder %s897_s18, %s897_s18 }
  0x3d   :  { %p765_p13 = scmp.ne.s32.totalorder %s897_s18, %s764_s21  ;;  %p770_p1 = scmp.lt.s32.totalorder %s764_s21, %s764_s21 }
  0x3f   :  { %p771_p2 = por %p770_p1, %p769_p0 }
  0x41   :  { %p772_p3 = pnand %p771_p2, %p765_p13 }
  0x43   :  { %775 = shalt.err (!%p772_p3)
}
  0x44   :  { %69 = dma.hbm_to_vmem [thread:$0]  %s1014_s5, 512, %s897_s18, [#allocation9], %s807_s19, %s807_s19, %s808_s20  }
  0x45   :  { %798 = dma.done.wait [#allocation3], 256  }
  0x46   :  { %799 = vsyncadd [#allocation3], 4294967040 }
  0x47   :  { %800 = dma.done.wait [#allocation6], 1024  }
  0x48   :  { %801 = vsyncadd [#allocation6], 4294966272 }
  0x49   :  { %802 = dma.done.wait [#allocation9], 512  }
  0x4a   :  { %803 = vsyncadd [#allocation9], 4294966784  ;;  %v814_v0 = vmov 0.0   ;;  %vm815_vm0 = vmmov 0   ;;  %v672_v1 = vld [vmem:[#allocation5] sm:$0xff]   ;;  %v673_v2 = vld [vmem:[#allocation5 + $0x8] sm:$0xff]  }
  0x4b   :  { %613 = vmatprep.subr.bf16.mxu0 %v814_v0  ;;  %617 = vmatprep.mubr.msk.bf16.mxu0 %vm815_vm0, %v814_v0  ;;  %v89_v3 = vld [vmem:[#allocation2] sm:$0xff]  ;;  %v90_v4 = vld [vmem:[#allocation2 + $0x8] sm:$0xff]  ;;  %vm113_vm1 = vcmask 261120   ;;  %v674_v6 = vld [vmem:[#allocation7] sm:$0xff]   ;;  %s816_s30 = smov [#allocation10]  }
  0x4c   :  { %621 = vmatprep.subr.bf16.mxu1 %v814_v0  ;;  %625 = vmatprep.mubr.msk.bf16.mxu1 %vm815_vm0, %v814_v0  ;;  %v91_v5 = vpack.c.bf16 %v90_v4, %v89_v3  ;;  %v675_v7 = vld [vmem:[#allocation7 + $0x8] sm:$0xff]   ;;  %v569_v8 = vld [vmem:[%s1011_s2] ss:$0 sm:$0xff]  ;;  %v676_v18 = vld [vmem:[#allocation8] sm:$0xff]   ;;  %s555_s11 = sshll.u32 %s816_s30, 4  ;;  %s556_s11 = int_to_ptr.vmem [resolvable:$true] %s555_s11 }
  0x4d   :  { %614 = vmatpush3.bf16.msra.mxu0 %v672_v1  ;;  %622 = vmatpush3.bf16.msra.mxu1 %v674_v6  ;;  %v677_v19 = vld [vmem:[#allocation8 + $0x8] sm:$0xff]   ;;  %v573_v20 = vld [vmem:[%s1013_s4] ss:$0 sm:$0xff]  ;;  %v679_v31 = vld [vmem:[#allocation5 + $0x18] sm:$0xff]   ;;  %s776_s12 = scalar_lea.vmem %s556_s11, 256  ;;  %p781_p5 = scmp.lt.s32.totalorder %s556_s11, %s556_s11 }
  0x4e   :  { %615 = vmatprep.subr.bf16.mxu0 %v814_v0  ;;  %623 = vmatprep.subr.bf16.mxu1 %v814_v0  ;;  %v678_v30 = vld [vmem:[#allocation5 + $0x10] sm:$0xff]   ;;  %v681_v43 = vld [vmem:[#allocation7 + $0x18] sm:$0xff]   ;;  %p777_p4 = scmp.ne.s32.totalorder %s556_s11, %s776_s12  ;;  %p782_p6 = scmp.lt.s32.totalorder %s776_s12, %s776_s12 }
  0x4f   :  { %v577_v32 = vld [vmem:[%s1015_s6] ss:$0 sm:$0xff]  ;;  %v581_v44 = vld [vmem:[%s1011_s2 + $0x1] ss:$0 sm:$0xff]  ;;  %v683_v55 = vld [vmem:[#allocation8 + $0x18] sm:$0xff]  }
  0x50   :  { %v680_v42 = vld [vmem:[#allocation7 + $0x10] sm:$0xff]   ;;  %p783_p7 = por %p782_p6, %p781_p5 }
  0x51   :  { %616 = vmatpush3.bf16.msra.mxu0 %v673_v2  ;;  %624 = vmatpush3.bf16.msra.mxu1 %v675_v7  ;;  %v682_v54 = vld [vmem:[#allocation8 + $0x10] sm:$0xff]  }
  0x52   :  { %629 = vmatprep.subr.bf16.mxu0 %v814_v0  ;;  %637 = vmatprep.subr.bf16.mxu1 %v814_v0  ;;  %v585_v56 = vld [vmem:[%s1013_s4 + $0x1] ss:$0 sm:$0xff]  ;;  %p784_p8 = pnand %p783_p7, %p777_p4 }
  0x54   :  { %618 = vmatmul.mubr.msk.bf16.vlgmr.msra.gmra.mrb[0].mxu0 %vm113_vm1, %v91_v5 }
  0x55   :  { %633 = vmatprep.mubr.msk.bf16.mxu0 %vm815_vm0, %v814_v0  ;;  %630 = vmatpush3.bf16.msra.mxu0 %v676_v18 }
  0x56   :  { %631 = vmatprep.subr.bf16.mxu0 %v814_v0 }
  0x59   :  { %632 = vmatpush3.bf16.msra.mxu0 %v677_v19 }
  0x5a   :  { %645 = vmatprep.subr.bf16.mxu0 %v814_v0 }
 0x127   :  { %v151_v9 = vpop.f32.mrb[0].mxu0 }
 0x128   :  { %v152_v10 = vadd.f32 %v569_v8, %v151_v9  ;;  %v619_v11 = vpop.f32.mrb[1].mxu0 }
 0x129   :  { %v154_v12 = vpop.f32.mrb[2].mxu0 }
 0x12a   :  { %v155_v13 = vadd.f32 %v569_v8, %v154_v12  ;;  %v620_v14 = vpop.f32.mrb[3].mxu0  ;;  %v158_v15 = vmax.f32 %v152_v10, 0.0 }
 0x12c   :  { %v159_v16 = vmax.f32 %v155_v13, 0.0 }
 0x12e   :  { %v160_v17 = vpack.c.bf16 %v159_v16, %v158_v15 }
 0x130   :  { %626 = vmatmul.mubr.msk.bf16.vlgmr.msra.gmra.mrb[0].mxu1 %vm113_vm1, %v160_v17 }
 0x131   :  { %641 = vmatprep.mubr.msk.bf16.mxu1 %vm815_vm0, %v814_v0  ;;  %638 = vmatpush3.bf16.msra.mxu1 %v678_v30  ;;  %v593_v30 = vld [vmem:[%s1016_s7] ss:$0 sm:$0xff] }
 0x132   :  { %639 = vmatprep.subr.bf16.mxu1 %v814_v0 }
 0x135   :  { %640 = vmatpush3.bf16.msra.mxu1 %v679_v31 }
 0x136   :  { %653 = vmatprep.subr.bf16.mxu1 %v814_v0 }
 0x203   :  { %v219_v21 = vpop.f32.mrb[0].mxu1 }
 0x204   :  { %v220_v22 = vadd.f32 %v573_v20, %v219_v21  ;;  %v627_v23 = vpop.f32.mrb[1].mxu1 }
 0x205   :  { %v222_v24 = vpop.f32.mrb[2].mxu1 }
 0x206   :  { %v223_v25 = vadd.f32 %v573_v20, %v222_v24  ;;  %v628_v26 = vpop.f32.mrb[3].mxu1  ;;  %v226_v27 = vmax.f32 %v220_v22, 0.0 }
 0x208   :  { %v227_v28 = vmax.f32 %v223_v25, 0.0 }
 0x20a   :  { %v228_v29 = vpack.c.bf16 %v227_v28, %v226_v27 }
 0x20c   :  { %634 = vmatmul.mubr.msk.bf16.vlgmr.msra.gmra.mrb[4].mxu0 %vm113_vm1, %v228_v29 }
 0x20d   :  { %649 = vmatprep.mubr.msk.bf16.mxu0 %vm815_vm0, %v814_v0  ;;  %646 = vmatpush3.bf16.msra.mxu0 %v680_v42 }
 0x20e   :  { %647 = vmatprep.subr.bf16.mxu0 %v814_v0 }
 0x211   :  { %648 = vmatpush3.bf16.msra.mxu0 %v681_v43 }
 0x2df   :  { %v287_v33 = vpop.f32.mrb[4].mxu0 }
 0x2e0   :  { %v288_v34 = vadd.f32 %v577_v32, %v287_v33  ;;  %v635_v35 = vpop.f32.mrb[5].mxu0 }
 0x2e1   :  { %v290_v36 = vpop.f32.mrb[6].mxu0 }
 0x2e2   :  { %v291_v37 = vadd.f32 %v577_v32, %v290_v36  ;;  %v636_v38 = vpop.f32.mrb[7].mxu0  ;;  %v294_v39 = vadd.f32 %v288_v34, %v89_v3  ;;  %v594_v32 = vld [vmem:[%s1017_s8] ss:$0 sm:$0xff] }
 0x2e4   :  { %v295_v40 = vadd.f32 %v291_v37, %v90_v4 }
 0x2e6   :  { %v296_v41 = vpack.c.bf16 %v295_v40, %v294_v39 }
 0x2e8   :  { %642 = vmatmul.mubr.msk.bf16.vlgmr.msra.gmra.mrb[4].mxu1 %vm113_vm1, %v296_v41 }
 0x2e9   :  { %657 = vmatprep.mubr.msk.bf16.mxu1 %vm815_vm0, %v814_v0  ;;  %654 = vmatpush3.bf16.msra.mxu1 %v682_v54 }
 0x2ea   :  { %655 = vmatprep.subr.bf16.mxu1 %v814_v0  ;;  %v589_v0 = vld [vmem:[%s1015_s6 + $0x1] ss:$0 sm:$0xff] }
 0x2ed   :  { %656 = vmatpush3.bf16.msra.mxu1 %v683_v55 }
 0x3bb   :  { %v356_v45 = vpop.f32.mrb[4].mxu1 }
 0x3bc   :  { %v357_v46 = vadd.f32 %v581_v44, %v356_v45  ;;  %v643_v47 = vpop.f32.mrb[5].mxu1 }
 0x3bd   :  { %v359_v48 = vpop.f32.mrb[6].mxu1 }
 0x3be   :  { %v360_v49 = vadd.f32 %v581_v44, %v359_v48  ;;  %v644_v50 = vpop.f32.mrb[7].mxu1  ;;  %v363_v51 = vmax.f32 %v357_v46, 0.0 }
 0x3c0   :  { %v364_v52 = vmax.f32 %v360_v49, 0.0 }
 0x3c2   :  { %v365_v53 = vpack.c.bf16 %v364_v52, %v363_v51 }
 0x3c4   :  { %650 = vmatmul.mubr.msk.bf16.vlgmr.msra.gmra.mrb[8].mxu0 %vm113_vm1, %v365_v53 }
 0x497   :  { %v425_v57 = vpop.f32.mrb[8].mxu0 }
 0x498   :  { %v426_v58 = vadd.f32 %v585_v56, %v425_v57  ;;  %v651_v59 = vpop.f32.mrb[9].mxu0 }
 0x499   :  { %v428_v60 = vpop.f32.mrb[10].mxu0 }
 0x49a   :  { %v429_v61 = vadd.f32 %v585_v56, %v428_v60  ;;  %v652_v62 = vpop.f32.mrb[11].mxu0  ;;  %v432_v63 = vmax.f32 %v426_v58, 0.0 }
 0x49c   :  { %v433_v1 = vmax.f32 %v429_v61, 0.0 }
 0x49e   :  { %v434_v2 = vpack.c.bf16 %v433_v1, %v432_v63 }
 0x4a0   :  { %658 = vmatmul.mubr.msk.bf16.vlgmr.msra.gmra.mrb[8].mxu1 %vm113_vm1, %v434_v2 }
 0x573   :  { %v494_v3 = vpop.f32.mrb[8].mxu1 }
 0x574   :  { %v495_v4 = vadd.f32 %v589_v0, %v494_v3  ;;  %v659_v5 = vpop.f32.mrb[9].mxu1 }
 0x575   :  { %v497_v6 = vpop.f32.mrb[10].mxu1 }
 0x576   :  { %v498_v7 = vadd.f32 %v589_v0, %v497_v6  ;;  %v660_v8 = vpop.f32.mrb[11].mxu1  ;;  %v501_v9 = vadd.f32 %v495_v4, %v294_v39 }
 0x578   :  { %v503_v10 = vsel %vm113_vm1, %v501_v9, 0.0  ;;  %v502_v11 = vadd.f32 %v498_v7, %v295_v40 }
 0x579   :  { %504 = vadd.xlane.f32.xlu0 %v503_v10 }
 0x57a   :  { %v506_v12 = vsel %vm113_vm1, %v502_v11, 0.0 }
 0x57d   :  { %507 = vadd.xlane.f32.xlu0 %v506_v12 }
 0x606   :  { %v505_v13 = vpop.xlane.xlu0 %504 }
 0x607   :  { %v510_v14 = vmul.f32 0.03125, %v505_v13 }
 0x609   :  { %v512_v15 = vsub.f32 %v501_v9, %v510_v14 }
 0x60a   :  { %v508_v16 = vpop.xlane.xlu0 %507 }
 0x60b   :  { %v511_v17 = vmul.f32 0.03125, %v508_v16  ;;  %v514_v18 = vmul.f32 %v512_v15, %v512_v15 }
 0x60d   :  { %v513_v19 = vsub.f32 %v502_v11, %v511_v17  ;;  %v516_v20 = vsel %vm113_vm1, %v514_v18, 0.0 }
 0x60e   :  { %517 = vadd.xlane.f32.xlu1 %v516_v20 }
 0x60f   :  { %v515_v21 = vmul.f32 %v513_v19, %v513_v19 }
 0x611   :  { %v519_v22 = vsel %vm113_vm1, %v515_v21, 0.0 }
 0x612   :  { %520 = vadd.xlane.f32.xlu1 %v519_v22 }
 0x69b   :  { %v518_v23 = vpop.xlane.xlu1 %517 }
 0x69c   :  { %v522_v24 = vmul.f32 0.03125, %v518_v23 }
 0x69e   :  { %v524_v25 = vadd.f32 1e-05, %v522_v24 }
 0x69f   :  { %v521_v26 = vpop.xlane.xlu1 %520 }
 0x6a0   :  { %684 = vrsqrt.f32 %v524_v25  ;;  %v523_v27 = vmul.f32 0.03125, %v521_v26 }
 0x6a2   :  { %v525_v28 = vadd.f32 1e-05, %v523_v27 }
 0x6a4   :  { %686 = vrsqrt.f32 %v525_v28 }
 0x6aa   :  { %v685_v29 = vpop.eup %684 }
 0x6ab   :  { %v528_v31 = vmul.f32 %v685_v29, %v512_v15 }
 0x6ad   :  { %v537_v33 = vmul.f32 %v593_v30, %v528_v31 }
 0x6ae   :  { %v687_v34 = vpop.eup %686 }
 0x6af   :  { %v529_v35 = vmul.f32 %v687_v34, %v513_v19  ;;  %v546_v36 = vadd.f32 %v594_v32, %v537_v33 }
 0x6b1   :  { %v538_v37 = vmul.f32 %v593_v30, %v529_v35  ;;  %548 = vst.msk [vmem:[#allocation10] sm:$0xff] %vm113_vm1, %v546_v36 }
 0x6b3   :  { %v547_v38 = vadd.f32 %v594_v32, %v538_v37 }
 0x6b5   :  { %549 = vst.msk [vmem:[#allocation10 + $0x8] sm:$0xff] %vm113_vm1, %v547_v38 }
 0x6b6   :  { %787 = shalt.err (!%p784_p8)
}
 0x6b7   :  { %s788_s13 = scalar_lea.hbm %s1018_s9, 256 }
 0x6b8   :  { %p789_p9 = scmp.ne.s32.totalorder %s1018_s9, %s788_s13  ;;  %p792_p10 = scmp.lt.u32.totalorder %s788_s13, %s1018_s9 }
 0x6ba   :  { %p794_p11 = pnand %p792_p10, %p789_p9 }
 0x6bc   :  { %797 = shalt.err (!%p794_p11)
}
 0x6bd   :  { %561 = dma.vmem_to_hbm [thread:$0]  %s556_s11, 256, %s1018_s9, [#allocation4], %s810_s1, %s810_s1, %s811_s10  }
 0x6be   :  { %804 = dma.done.wait [#allocation4], 256  }
 0x6bf   :  { %805 = vsyncadd [#allocation4], 4294967040 }
 0x6c0   :  { %565 = vsyncpa [#allocation3], 1 }
 0x6c1   :  { %566 = vsyncpa [#allocation6], 1 }
 0x6c2   :  { %567 = vsyncpa [#allocation9], 1 }
 0x6c3   :  { %568 = vsyncpa [#allocation4], 1 }

</bundles_post_ra>
